<compile_context>
chip_gen: v6e
topology: v6e:2x2x1
jax: 0.10.0
libtpu: 0.0.40
codegen_flags: <defaults>
</compile_context>

<pallas_src>
import math

import jax
import jax.numpy as jnp
from jax.experimental import pallas as pl
from jax.experimental.pallas import tpu as pltpu

_LOG_2PI = math.log(2.0 * math.pi)


# ---------------------------------------------------------------------------
# Kernels
# ---------------------------------------------------------------------------

def _partial_sums_kernel(mu_y_ref, sigma_y_ref, y_ref,
                         mu_c_ref, sigma_c_ref, mu_ct_ref, sigma_ct_ref,
                         out_ref):
    """One grid step over a (1, z_tile, B*T*Y) slice of the likelihood tensors.

    Writes a (1, 1, 2) row: [partial sum of the log-lik core over this block,
    total KL over all (batch, latent) elements].  Inputs arrive in their native
    dtype and are cast to f32 after the Ref load (HBM traffic stays native-width,
    compute stays f32 — v5e VPU/EUP have no bf16).
    """
    mu = mu_y_ref[...].astype(jnp.float32)          # (1, z_tile, BTY)
    sg = sigma_y_ref[...].astype(jnp.float32)
    y = y_ref[...].astype(jnp.float32)              # (1, BTY) -> broadcasts over z

    # Approx reciprocal only feeds the quadratic term; the log term is computed
    # on sigma directly so it never sees the approximate value.
    inv_sigma = pl.reciprocal(sg, approx=True)
    diff = (y - mu) * inv_sigma
    core = -jnp.log(sg) - 0.5 * (diff * diff)       # -0.5*log(2*pi) folded out
    ll = jnp.sum(core, axis=(1, 2), keepdims=True)  # (1, 1, 1) partial sum

    # KL( q(z|C,T) || q(z|C) ), diagonal Gaussians; tiny (B, Z) arrays so the
    # redundant per-step recompute is negligible.
    m0 = mu_c_ref[...].astype(jnp.float32)
    s0 = sigma_c_ref[...].astype(jnp.float32)
    m1 = mu_ct_ref[...].astype(jnp.float32)
    s1 = sigma_ct_ref[...].astype(jnp.float32)
    B, Z = m0.shape
    var0 = s0 * s0
    var1 = s1 * s1
    d = m1 - m0
    kl_core = jnp.log(s0) - jnp.log(s1) + (var1 + d * d) / (2.0 * var0)
    kl = jnp.sum(kl_core, axis=(0, 1), keepdims=True) - 0.5 * (B * Z)   # (1, 1)
    kl3 = kl.reshape(1, 1, 1)

    # Pack [ll, kl] into one (1, 1, 2) value -> a single store.
    lane = jax.lax.broadcasted_iota(jnp.int32, (1, 1, 2), 2)
    out_ref[...] = jnp.where(lane == 0, ll, kl3)


def _per_batch_loss_kernel(mu_y_ref, sigma_y_ref, y_ref,
                           mu_c_ref, sigma_c_ref, mu_ct_ref, sigma_ct_ref,
                           out_ref):
    """reduction=None path: single packed (3, B) output [loss; kl; nll].

    q-params arrive as (Z, B) so the KL reduce is a sublane reduce landing in
    (1, B) row layout (no in-kernel transpose).
    """
    n_z, B, TY = mu_y_ref.shape
    Z = mu_c_ref.shape[0]

    mu = mu_y_ref[...].astype(jnp.float32)          # (n_z, B, TY)
    sg = sigma_y_ref[...].astype(jnp.float32)
    y = y_ref[...].astype(jnp.float32)              # (B, TY)

    inv_sigma = pl.reciprocal(sg, approx=True)
    diff = (y[None] - mu) * inv_sigma
    core = -jnp.log(sg) - 0.5 * (diff * diff)       # (n_z, B, TY)
    core_zb = jnp.sum(core, axis=2)                 # (n_z, B) lane reduce
    nll_row = (-jnp.sum(core_zb, axis=0, keepdims=True) * (1.0 / n_z)
               + 0.5 * _LOG_2PI * TY)               # (1, B)

    m0 = mu_c_ref[...].astype(jnp.float32)          # (Z, B)
    s0 = sigma_c_ref[...].astype(jnp.float32)
    m1 = mu_ct_ref[...].astype(jnp.float32)
    s1 = sigma_ct_ref[...].astype(jnp.float32)
    var0 = s0 * s0
    var1 = s1 * s1
    d = m1 - m0
    kl_core = jnp.log(s0) - jnp.log(s1) + (var1 + d * d) / (2.0 * var0)   # (Z, B)
    kl_row = jnp.sum(kl_core, axis=0, keepdims=True) - 0.5 * Z            # (1, B)

    loss_row = nll_row + kl_row
    row = jax.lax.broadcasted_iota(jnp.int32, (3, B), 0)
    out_ref[...] = jnp.where(row == 0, loss_row,
                             jnp.where(row == 1, kl_row, nll_row))        # one store


# ---------------------------------------------------------------------------
# Wrapper
# ---------------------------------------------------------------------------

def _pick_z_tile(n_z, bty, itemsize, budget_bytes=8 * 1024 * 1024):
    """Largest divisor of n_z whose double-buffered mu/sigma blocks fit the budget."""
    row_bytes = max(1, bty * itemsize)
    cap = max(1, budget_bytes // (4 * row_bytes))   # 2 tensors x 2 pipeline buffers
    best = 1
    for d in range(1, n_z + 1):
        if n_z % d == 0 and d <= cap:
            best = d
    return best


def loss_forward(pred_outputs, y_target, reduction="mean", z_tile=None):
    """Mirrors Loss.forward in training mode. Returns (loss, kl_z, negative_ll)."""
    (mu_y, sigma_y), z_samples, (mu_c, sigma_c), (mu_ct, sigma_ct) = pred_outputs
    del z_samples  # not used by the ELBO loss (matches NPF get_loss)

    n_z, B, T, Y = mu_y.shape
    Z = mu_c.shape[-1]
    BTY = B * T * Y

    if reduction in ("mean", "sum"):
        if z_tile is None:
            z_tile = _pick_z_tile(n_z, BTY, mu_y.dtype.itemsize)
        if n_z % z_tile != 0:
            raise ValueError("z_tile must divide n_z")
        nblk = n_z // z_tile

        # Free row-major reshapes; native dtype (no host upcast), lane-dense last axis.
        mu_y_f = mu_y.reshape(nblk, z_tile, BTY)
        sigma_y_f = sigma_y.reshape(nblk, z_tile, BTY)
        y_f = y_target.reshape(1, BTY)

        spec_ll = pl.BlockSpec((1, z_tile, BTY), lambda i: (i, 0, 0))
        spec_y = pl.BlockSpec((1, BTY), lambda i: (0, 0))
        spec_q = pl.BlockSpec((B, Z), lambda i: (0, 0))

        out = pl.pallas_call(
            _partial_sums_kernel,
            grid=(nblk,),
            in_specs=[spec_ll, spec_ll, spec_y, spec_q, spec_q, spec_q, spec_q],
            out_specs=pl.BlockSpec((1, 1, 2), lambda i: (i, 0, 0)),
            out_shape=jax.ShapeDtypeStruct((nblk, 1, 2), jnp.float32),
            compiler_params=pltpu.CompilerParams(
                dimension_semantics=("parallel",)),
        )(mu_y_f, sigma_y_f, y_f, mu_c, sigma_c, mu_ct, sigma_ct)

        # Trivial cross-tile accumulation, kept in f32.
        ll_total = jnp.sum(out[:, 0, 0])
        kl_total = out[0, 0, 1]                      # identical in every row
        nll_total = -ll_total * (1.0 / n_z) + 0.5 * _LOG_2PI * BTY
        loss_total = nll_total + kl_total
        scale = 1.0 / B if reduction == "mean" else 1.0
        return loss_total * scale, kl_total * scale, nll_total * scale

    elif reduction is None:
        # TODO(synk): grid this path over n_z (accumulator scratch) for large shapes.
        TY = T * Y
        mu_y_f = mu_y.reshape(n_z, B, TY)
        sigma_y_f = sigma_y.reshape(n_z, B, TY)
        y_f = y_target.reshape(B, TY)
        # q-params fed as (Z, B): KL reduce lands directly in (1, B) row layout.
        q_args = (mu_c.T, sigma_c.T, mu_ct.T, sigma_ct.T)

        spec_y3 = pl.BlockSpec((n_z, B, TY), lambda i: (0, 0, 0))
        spec_y2 = pl.BlockSpec((B, TY), lambda i: (0, 0))
        spec_q = pl.BlockSpec((Z, B), lambda i: (0, 0))

        out = pl.pallas_call(
            _per_batch_loss_kernel,
            grid=(1,),
            in_specs=[spec_y3, spec_y3, spec_y2, spec_q, spec_q, spec_q, spec_q],
            out_specs=pl.BlockSpec((3, B), lambda i: (0, 0)),
            out_shape=jax.ShapeDtypeStruct((3, B), jnp.float32),
            compiler_params=pltpu.CompilerParams(
                dimension_semantics=("arbitrary",)),
        )(mu_y_f, sigma_y_f, y_f, *q_args)
        return out[0], out[1], out[2]
    else:
        raise NotImplementedError


# ---------------------------------------------------------------------------
# Pure-JAX reference
# ---------------------------------------------------------------------------

def _reference(pred_outputs, y_target):
    """Per-batch (loss, kl, nll) arrays of shape (B,)."""
    (mu_y, sigma_y), _, (mu_c, sigma_c), (mu_ct, sigma_ct) = pred_outputs
    log_p = (-0.5 * ((y_target[None] - mu_y) / sigma_y) ** 2
             - jnp.log(sigma_y) - 0.5 * _LOG_2PI)
    nll = -jnp.mean(jnp.sum(log_p, axis=(2, 3)), axis=0)
    kl = jnp.sum(jnp.log(sigma_c) - jnp.log(sigma_ct)
                 + (sigma_ct ** 2 + (mu_ct - mu_c) ** 2) / (2.0 * sigma_c ** 2) - 0.5,
                 axis=-1)
    return nll + kl, kl, nll


if __name__ == "__main__":
    # Small, forward-consistent shapes: 4 z-samples, batch 2, 8 target points,
    # y-dim 2, latent dim 32.
    n_z, B, T, Y, Z = 4, 2, 8, 2, 32
    key = jax.random.PRNGKey(0)
    ks = jax.random.split(key, 8)

    mu_y = jax.random.normal(ks[0], (n_z, B, T, Y), jnp.float32)
    sigma_y = 0.1 + jax.nn.softplus(jax.random.normal(ks[1], (n_z, B, T, Y), jnp.float32))
    y_target = jax.random.normal(ks[2], (B, T, Y), jnp.float32)
    mu_c = jax.random.normal(ks[3], (B, Z), jnp.float32)
    sigma_c = 0.1 + jax.nn.softplus(jax.random.normal(ks[4], (B, Z), jnp.float32))
    mu_ct = jax.random.normal(ks[5], (B, Z), jnp.float32)
    sigma_ct = 0.1 + jax.nn.softplus(jax.random.normal(ks[6], (B, Z), jnp.float32))
    z_samples = jax.random.normal(ks[7], (n_z, B, Z), jnp.float32)

    pred_outputs = ((mu_y, sigma_y), z_samples, (mu_c, sigma_c), (mu_ct, sigma_ct))
    ref_loss_b, ref_kl_b, ref_nll_b = _reference(pred_outputs, y_target)

    rtol, atol = 2e-3, 1e-2   # approx reciprocal on the 1/sigma path

    # mean / sum reductions (auto tile -> whole-n_z block at this toy size).
    loss_m, kl_m, nll_m = loss_forward(pred_outputs, y_target, reduction="mean")
    loss_s, kl_s, nll_s = loss_forward(pred_outputs, y_target, reduction="sum")
    jax.block_until_ready((loss_m, kl_m, nll_m, loss_s, kl_s, nll_s))
    assert jnp.allclose(loss_m, jnp.mean(ref_loss_b), rtol=rtol, atol=atol)
    assert jnp.allclose(kl_m, jnp.mean(ref_kl_b), rtol=rtol, atol=atol)
    assert jnp.allclose(nll_m, jnp.mean(ref_nll_b), rtol=rtol, atol=atol)
    assert jnp.allclose(loss_s, jnp.sum(ref_loss_b), rtol=rtol, atol=atol)
    assert jnp.allclose(kl_s, jnp.sum(ref_kl_b), rtol=rtol, atol=atol)
    assert jnp.allclose(nll_s, jnp.sum(ref_nll_b), rtol=rtol, atol=atol)

    # Forced z_tile=1 -> grid=(n_z,) exercises the multi-tile partial-sum path.
    loss_g, kl_g, nll_g = loss_forward(pred_outputs, y_target, reduction="mean", z_tile=1)
    jax.block_until_ready((loss_g, kl_g, nll_g))
    assert jnp.allclose(loss_g, jnp.mean(ref_loss_b), rtol=rtol, atol=atol)
    assert jnp.allclose(kl_g, jnp.mean(ref_kl_b), rtol=rtol, atol=atol)
    assert jnp.allclose(nll_g, jnp.mean(ref_nll_b), rtol=rtol, atol=atol)

    # reduction=None (per-batch) path.
    loss_b, kl_b, nll_b = loss_forward(pred_outputs, y_target, reduction=None)
    jax.block_until_ready((loss_b, kl_b, nll_b))
    assert jnp.allclose(loss_b, ref_loss_b, rtol=rtol, atol=atol)
    assert jnp.allclose(kl_b, ref_kl_b, rtol=rtol, atol=atol)
    assert jnp.allclose(nll_b, ref_nll_b, rtol=rtol, atol=atol)

    # Native-bf16 inputs: HBM stays bf16, kernel casts to f32 in VMEM.
    bf = jnp.bfloat16
    pred_bf = ((mu_y.astype(bf), sigma_y.astype(bf)), z_samples,
               (mu_c.astype(bf), sigma_c.astype(bf)),
               (mu_ct.astype(bf), sigma_ct.astype(bf)))
    y_bf = y_target.astype(bf)
    pred_bf_f32 = (((mu_y.astype(bf)).astype(jnp.float32),
                    (sigma_y.astype(bf)).astype(jnp.float32)), z_samples,
                   ((mu_c.astype(bf)).astype(jnp.float32),
                    (sigma_c.astype(bf)).astype(jnp.float32)),
                   ((mu_ct.astype(bf)).astype(jnp.float32),
                    (sigma_ct.astype(bf)).astype(jnp.float32)))
    ref_loss_bf, ref_kl_bf, ref_nll_bf = _reference(pred_bf_f32, y_bf.astype(jnp.float32))
    loss_bm, kl_bm, nll_bm = loss_forward(pred_bf, y_bf, reduction="mean")
    jax.block_until_ready((loss_bm, kl_bm, nll_bm))
    assert jnp.allclose(loss_bm, jnp.mean(ref_loss_bf), rtol=rtol, atol=atol)
    assert jnp.allclose(kl_bm, jnp.mean(ref_kl_bf), rtol=rtol, atol=atol)
    assert jnp.allclose(nll_bm, jnp.mean(ref_nll_bf), rtol=rtol, atol=atol)

    print("KERNEL_OK")
</pallas_src>

<mosaic_0001>
module attributes {stable_mosaic.version = 11 : i64} {
  func.func @_partial_sums_kernel(%arg0: i32, %arg1: memref<1x4x32xf32, #tpu.memory_space<vmem>>, %arg2: memref<1x4x32xf32, #tpu.memory_space<vmem>>, %arg3: memref<1x32xf32, #tpu.memory_space<vmem>>, %arg4: memref<2x32xf32, #tpu.memory_space<vmem>>, %arg5: memref<2x32xf32, #tpu.memory_space<vmem>>, %arg6: memref<2x32xf32, #tpu.memory_space<vmem>>, %arg7: memref<2x32xf32, #tpu.memory_space<vmem>>, %arg8: memref<1x1x2xf32, #tpu.memory_space<vmem>>) attributes {dimension_semantics = [#tpu.dimension_semantics<parallel>], iteration_bounds = array<i64: 1>, scalar_prefetch = 0 : i64, scratch_operands = 0 : i64, tpu.core_type = #tpu.core_type<tc>, window_params = [{transform_indices = @transform_0, window_bounds = array<i64: 1, 4, 32>}, {transform_indices = @transform_1, window_bounds = array<i64: 1, 4, 32>}, {pipeline_mode = #tpu.pipeline_mode<synchronous>, transform_indices = @transform_2, window_bounds = array<i64: 1, 32>}, {pipeline_mode = #tpu.pipeline_mode<synchronous>, transform_indices = @transform_3, window_bounds = array<i64: 2, 32>}, {pipeline_mode = #tpu.pipeline_mode<synchronous>, transform_indices = @transform_4, window_bounds = array<i64: 2, 32>}, {pipeline_mode = #tpu.pipeline_mode<synchronous>, transform_indices = @transform_5, window_bounds = array<i64: 2, 32>}, {pipeline_mode = #tpu.pipeline_mode<synchronous>, transform_indices = @transform_6, window_bounds = array<i64: 2, 32>}, {transform_indices = @transform_7, window_bounds = array<i64: 1, 1, 2>}]} {
    %c0 = arith.constant 0 : index
    %c0_0 = arith.constant 0 : index
    %c0_1 = arith.constant 0 : index
    %0 = vector.load %arg1[%c0, %c0_0, %c0_1] : memref<1x4x32xf32, #tpu.memory_space<vmem>>, vector<1x4x32xf32>
    %c0_2 = arith.constant 0 : index
    %c0_3 = arith.constant 0 : index
    %c0_4 = arith.constant 0 : index
    %1 = vector.load %arg2[%c0_2, %c0_3, %c0_4] : memref<1x4x32xf32, #tpu.memory_space<vmem>>, vector<1x4x32xf32>
    %c0_5 = arith.constant 0 : index
    %c0_6 = arith.constant 0 : index
    %2 = vector.load %arg3[%c0_5, %c0_6] : memref<1x32xf32, #tpu.memory_space<vmem>>, vector<1x32xf32>
    %3 = tpu.reciprocal %1 {approx = true} : vector<1x4x32xf32> -> vector<1x4x32xf32>
    %4 = vector.shape_cast %2 : vector<1x32xf32> to vector<1x1x32xf32>
    %5 = vector.broadcast %4 : vector<1x1x32xf32> to vector<1x4x32xf32>
    %6 = arith.subf %5, %0 : vector<1x4x32xf32>
    %7 = arith.mulf %6, %3 : vector<1x4x32xf32>
    %8 = math.log %1 : vector<1x4x32xf32>
    %cst = arith.constant 0.000000e+00 : f32
    %9 = vector.broadcast %cst : f32 to vector<1x4x32xf32>
    %10 = arith.subf %9, %8 : vector<1x4x32xf32>
    %11 = arith.mulf %7, %7 : vector<1x4x32xf32>
    %cst_7 = arith.constant 5.000000e-01 : f32
    %12 = vector.broadcast %cst_7 : f32 to vector<1x4x32xf32>
    %13 = arith.mulf %12, %11 : vector<1x4x32xf32>
    %14 = arith.subf %10, %13 : vector<1x4x32xf32>
    %cst_8 = arith.constant dense<0.000000e+00> : vector<1xf32>
    %15 = vector.multi_reduction <add>, %14, %cst_8 [1, 2] : vector<1x4x32xf32> to vector<1xf32>
    %16 = vector.shape_cast %15 : vector<1xf32> to vector<1x1x1xf32>
    %c0_9 = arith.constant 0 : index
    %c0_10 = arith.constant 0 : index
    %17 = vector.load %arg4[%c0_9, %c0_10] : memref<2x32xf32, #tpu.memory_space<vmem>>, vector<2x32xf32>
    %c0_11 = arith.constant 0 : index
    %c0_12 = arith.constant 0 : index
    %18 = vector.load %arg5[%c0_11, %c0_12] : memref<2x32xf32, #tpu.memory_space<vmem>>, vector<2x32xf32>
    %c0_13 = arith.constant 0 : index
    %c0_14 = arith.constant 0 : index
    %19 = vector.load %arg6[%c0_13, %c0_14] : memref<2x32xf32, #tpu.memory_space<vmem>>, vector<2x32xf32>
    %c0_15 = arith.constant 0 : index
    %c0_16 = arith.constant 0 : index
    %20 = vector.load %arg7[%c0_15, %c0_16] : memref<2x32xf32, #tpu.memory_space<vmem>>, vector<2x32xf32>
    %21 = arith.mulf %18, %18 : vector<2x32xf32>
    %22 = arith.mulf %20, %20 : vector<2x32xf32>
    %23 = arith.subf %19, %17 : vector<2x32xf32>
    %24 = math.log %18 : vector<2x32xf32>
    %25 = math.log %20 : vector<2x32xf32>
    %26 = arith.subf %24, %25 : vector<2x32xf32>
    %27 = arith.mulf %23, %23 : vector<2x32xf32>
    %28 = arith.addf %22, %27 : vector<2x32xf32>
    %cst_17 = arith.constant 2.000000e+00 : f32
    %29 = vector.broadcast %cst_17 : f32 to vector<2x32xf32>
    %30 = arith.mulf %29, %21 : vector<2x32xf32>
    %31 = arith.divf %28, %30 : vector<2x32xf32>
    %32 = arith.addf %26, %31 : vector<2x32xf32>
    %33 = vector.shape_cast %32 : vector<2x32xf32> to vector<1x2x32xf32>
    %cst_18 = arith.constant dense<0.000000e+00> : vector<1xf32>
    %34 = vector.multi_reduction <add>, %33, %cst_18 [1, 2] : vector<1x2x32xf32> to vector<1xf32>
    %35 = vector.shape_cast %34 : vector<1xf32> to vector<1x1x1xf32>
    %36 = vector.extract %35[0, 0, 0] : f32 from vector<1x1x1xf32>
    %37 = vector.broadcast %36 : f32 to vector<1x1xf32>
    %cst_19 = arith.constant 3.200000e+01 : f32
    %38 = vector.broadcast %cst_19 : f32 to vector<1x1xf32>
    %39 = arith.subf %37, %38 : vector<1x1xf32>
    %40 = vector.shape_cast %39 : vector<1x1xf32> to vector<1x1x1xf32>
    %41 = tpu.iota {dimensions = array<i32: 2>} : vector<1x1x2xi32>
    %c0_i32 = arith.constant 0 : i32
    %42 = vector.broadcast %c0_i32 : i32 to vector<1x1x2xi32>
    %43 = arith.cmpi eq, %41, %42 : vector<1x1x2xi32>
    %44 = vector.shape_cast %16 : vector<1x1x1xf32> to vector<1x1x1xf32>
    %45 = vector.broadcast %44 : vector<1x1x1xf32> to vector<1x1x2xf32>
    %46 = vector.shape_cast %40 : vector<1x1x1xf32> to vector<1x1x1xf32>
    %47 = vector.broadcast %46 : vector<1x1x1xf32> to vector<1x1x2xf32>
    %48 = arith.select %43, %45, %47 : vector<1x1x2xi1>, vector<1x1x2xf32>
    %c0_20 = arith.constant 0 : index
    %c0_21 = arith.constant 0 : index
    %c0_22 = arith.constant 0 : index
    %49 = vector.load %arg8[%c0_20, %c0_21, %c0_22] : memref<1x1x2xf32, #tpu.memory_space<vmem>>, vector<1x1x2xf32>
    tpu.vector_store %arg8[%c0_20, %c0_21, %c0_22], %48 {strides = array<i32>} : memref<1x1x2xf32, #tpu.memory_space<vmem>>, vector<1x1x2xf32>,
    return
  }
  func.func @transform_0(%arg0: i32) -> (i32, i32, i32) {
    %c0_i32 = arith.constant 0 : i32
    %c0_i32_0 = arith.constant 0 : i32
    %c0_i32_1 = arith.constant 0 : i32
    return %arg0, %c0_i32, %c0_i32_0 : i32, i32, i32
  }
  func.func @transform_1(%arg0: i32) -> (i32, i32, i32) {
    %c0_i32 = arith.constant 0 : i32
    %c0_i32_0 = arith.constant 0 : i32
    %c0_i32_1 = arith.constant 0 : i32
    return %arg0, %c0_i32, %c0_i32_0 : i32, i32, i32
  }
  func.func @transform_2(%arg0: i32) -> (i32, i32) {
    %c0_i32 = arith.constant 0 : i32
    %c0_i32_0 = arith.constant 0 : i32
    %c0_i32_1 = arith.constant 0 : i32
    return %c0_i32, %c0_i32_0 : i32, i32
  }
  func.func @transform_3(%arg0: i32) -> (i32, i32) {
    %c0_i32 = arith.constant 0 : i32
    %c0_i32_0 = arith.constant 0 : i32
    %c0_i32_1 = arith.constant 0 : i32
    return %c0_i32, %c0_i32_0 : i32, i32
  }
  func.func @transform_4(%arg0: i32) -> (i32, i32) {
    %c0_i32 = arith.constant 0 : i32
    %c0_i32_0 = arith.constant 0 : i32
    %c0_i32_1 = arith.constant 0 : i32
    return %c0_i32, %c0_i32_0 : i32, i32
  }
  func.func @transform_5(%arg0: i32) -> (i32, i32) {
    %c0_i32 = arith.constant 0 : i32
    %c0_i32_0 = arith.constant 0 : i32
    %c0_i32_1 = arith.constant 0 : i32
    return %c0_i32, %c0_i32_0 : i32, i32
  }
  func.func @transform_6(%arg0: i32) -> (i32, i32) {
    %c0_i32 = arith.constant 0 : i32
    %c0_i32_0 = arith.constant 0 : i32
    %c0_i32_1 = arith.constant 0 : i32
    return %c0_i32, %c0_i32_0 : i32, i32
  }
  func.func @transform_7(%arg0: i32) -> (i32, i32, i32) {
    %c0_i32 = arith.constant 0 : i32
    %c0_i32_0 = arith.constant 0 : i32
    %c0_i32_1 = arith.constant 0 : i32
    return %arg0, %c0_i32, %c0_i32_0 : i32, i32, i32
  }
}

</mosaic_0001>

<bundles_post_ra>
// kernel: tpu_custom_call.1
= control target key start
LH: loop header
LB: loop body
LE: loop exit
PB: predicated region body
PF: predicated region fallthrough
CT: control target
= control target key end

     0   :  { %12 = vsyncpa [#allocation3], 0  ;;  %s282_s0 = inlined_call_operand.hbm [shape: f32[1,4,32], index: 0, kind: input, shape index: {}]   ;;  %s283_s1 = inlined_call_operand.hbm [shape: f32[1,4,32], index: 1, kind: input, shape index: {}]   ;;  %s284_s2 = inlined_call_operand.vmem [shape: f32[1,32], index: 2, kind: input, shape index: {}]   ;;  %s285_s3 = inlined_call_operand.vmem [shape: f32[2,32], index: 3, kind: input, shape index: {}]   ;;  %s286_s4 = inlined_call_operand.vmem [shape: f32[2,32], index: 4, kind: input, shape index: {}]   ;;  %s287_s5 = inlined_call_operand.vmem [shape: f32[2,32], index: 5, kind: input, shape index: {}]   ;;  %s288_s6 = inlined_call_operand.vmem [shape: f32[2,32], index: 6, kind: input, shape index: {}]   ;;  %s289_s7 = inlined_call_operand.hbm [shape: f32[1,1,2], index: 7, kind: output, shape index: {}]  }
   0x1   :  { %13 = vsyncpa [#allocation6], 0 }
   0x2   :  { %14 = vsyncpa [#allocation4], 0  ;;  %s215_s24 = smov [#allocation2]   ;;  %s216_s26 = smov [#allocation5]  }
   0x3   :  { %s21_s25 = sshll.u32 %s215_s24, 4  ;;  %s31_s27 = sshll.u32 %s216_s26, 4  ;;  %s22_s25 = int_to_ptr.vmem [resolvable:$true] %s21_s25  ;;  %s32_s27 = int_to_ptr.vmem [resolvable:$true] %s31_s27 }
   0x4   :  { %s157_s28 = scalar_lea.vmem %s22_s25, 64  ;;  %p162_p1 = scmp.lt.s32.totalorder %s22_s25, %s22_s25 }
   0x5   :  { %p158_p0 = scmp.ne.s32.totalorder %s22_s25, %s157_s28  ;;  %p163_p2 = scmp.lt.s32.totalorder %s157_s28, %s157_s28 }
   0x7   :  { %p164_p3 = por %p163_p2, %p162_p1 }
   0x9   :  { %p165_p4 = pnand %p164_p3, %p158_p0 }
   0xb   :  { %168 = shalt.err (!%p165_p4)
}
   0xc   :  { %24 = dma.hbm_to_vmem [thread:$0]  %s282_s0, 64, %s22_s25, [#allocation3]  }
   0xd   :  { %s177_s8 = scalar_lea.vmem %s32_s27, 64  ;;  %p182_p6 = scmp.lt.s32.totalorder %s32_s27, %s32_s27 }
   0xe   :  { %p178_p5 = scmp.ne.s32.totalorder %s32_s27, %s177_s8  ;;  %p183_p7 = scmp.lt.s32.totalorder %s177_s8, %s177_s8 }
  0x10   :  { %p184_p8 = por %p183_p7, %p182_p6 }
  0x12   :  { %p185_p9 = pnand %p184_p8, %p178_p5 }
  0x14   :  { %188 = shalt.err (!%p185_p9)
}
  0x15   :  { %34 = dma.hbm_to_vmem [thread:$0]  %s283_s1, 64, %s32_s27, [#allocation6]  }
  0x16   :  { %209 = dma.done.wait [#allocation3], 64  }
  0x17   :  { %210 = vsyncadd [#allocation3], 4294967232 }
  0x18   :  { %211 = dma.done.wait [#allocation6], 64  }
  0x19   :  { %212 = vsyncadd [#allocation6], 4294967232  ;;  %v80_v0 = vld [vmem:[%s286_s4] sm:$0x3]  ;;  %v52_v3 = vld [vmem:[#allocation5] sm:$0xf]  ;;  %v110_v43 = vlaneseq }
  0x1a   :  { %v82_v1 = vld [vmem:[%s288_s6] sm:$0x3]  ;;  %v83_v2 = vmul.f32 %v80_v0, %v80_v0  ;;  %139 = vlog2.f32 %v80_v0  ;;  %vm97_vm0 = vcmask 254976   ;;  %vm69_vm1 = vcmask 257024  }
  0x1b   :  { %141 = vlog2.f32 %v82_v1  ;;  %v79_v5 = vld [vmem:[%s285_s3] sm:$0x3]  ;;  %v84_v10 = vmul.f32 %v82_v1, %v82_v1  ;;  %v111_v45 = vand.u32 127, %v110_v43  ;;  %s217_s3 = smov [#allocation7]   ;;  %vm114_vm3 = vcmask 8192  }
  0x1c   :  { %v93_v4 = vmul.f32 2.0, %v83_v2  ;;  %143 = vrcp.f32 %v52_v3  ;;  %v81_v6 = vld [vmem:[%s287_s5] sm:$0x3]  ;;  %s122_s5 = sshll.u32 %s217_s3, 4  ;;  %s123_s5 = int_to_ptr.vmem [resolvable:$true] %s122_s5 }
  0x1d   :  { %145 = vlog2.f32 %v52_v3  ;;  %v85_v7 = vsub.f32 %v81_v6, %v79_v5  ;;  %v51_v8 = vld [vmem:[#allocation2] sm:$0xf]  ;;  %vm112_vm2 = vcmp.eq.s32.totalorder %v111_v45, 0  ;;  %s189_s17 = scalar_lea.vmem %s123_s5, 16  ;;  %s193_s18 = scalar_lea.vmem %s123_s5, 32 }
  0x1e   :  { %147 = vrcp.f32 %v93_v4  ;;  %v132_v9 = vld [vmem:[%s284_s2] ss:$0 sm:$0xff]  ;;  %p190_p10 = scmp.ne.s32.totalorder %s123_s5, %s189_s17  ;;  %p194_p11 = scmp.lt.s32.totalorder %s123_s5, %s123_s5 }
  0x1f   :  { %v91_v11 = vmul.f32 %v85_v7, %v85_v7  ;;  %v61_v12 = vsub.f32 %v132_v9, %v51_v8  ;;  %p195_p12 = scmp.lt.s32.totalorder %s193_s18, %s189_s17 }
  0x21   :  { %v92_v16 = vadd.f32 %v91_v11, %v84_v10  ;;  %p196_p13 = por %p195_p12, %p194_p11 }
  0x23   :  { %p197_p0 = pnand %p196_p13, %p190_p10 }
  0x27   :  { %v140_v13 = vpop.eup %139 }
  0x28   :  { %v142_v14 = vpop.eup %141  ;;  %v87_v15 = vmul.f32 0.6931472, %v140_v13 }
  0x29   :  { %v144_v17 = vpop.eup %143  ;;  %v89_v18 = vmul.f32 0.6931472, %v142_v14 }
  0x2a   :  { %v146_v19 = vpop.eup %145  ;;  %v62_v20 = vmul.f32 %v144_v17, %v61_v12 }
  0x2b   :  { %v148_v21 = vpop.eup %147  ;;  %v90_v22 = vsub.f32 %v87_v15, %v89_v18  ;;  %v64_v23 = vmul.f32 0.6931472, %v146_v19 }
  0x2c   :  { %v95_v24 = vmul.f32 %v148_v21, %v92_v16  ;;  %v66_v25 = vmul.f32 %v62_v20, %v62_v20 }
  0x2d   :  { %v65_v26 = vsub.f32 0.0, %v64_v23 }
  0x2e   :  { %v96_v27 = vadd.f32 %v95_v24, %v90_v22  ;;  %v67_v28 = vmul.f32 0.5, %v66_v25 }
  0x30   :  { %v98_v29 = vsel %vm97_vm0, %v96_v27, 0.0  ;;  %v68_v30 = vsub.f32 %v65_v26, %v67_v28 }
  0x31   :  { %99 = vadd.xlane.f32.xlu0 %v98_v29 }
  0x32   :  { %v70_v31 = vsel %vm69_vm1, %v68_v30, 0.0 }
  0x35   :  { %71 = vadd.xlane.f32.xlu0 %v70_v31 }
  0xba   :  { %v100_v32 = vpop.xlane.xlu0 %99 }
  0xbb   :  { %v101_v33 = vrot.slane %v100_v32, 4 }
  0xbd   :  { %v102_v34 = vadd.f32 %v101_v33, %v100_v32 }
  0xbe   :  { %v72_v39 = vpop.xlane.xlu0 %71 }
  0xbf   :  { %v103_v35 = vrot.slane %v102_v34, 2  ;;  %v73_v40 = vrot.slane %v72_v39, 4 }
  0xc1   :  { %v104_v36 = vadd.f32 %v103_v35, %v102_v34  ;;  %v74_v41 = vadd.f32 %v73_v40, %v72_v39 }
  0xc3   :  { %v105_v37 = vrot.slane %v104_v36, 1  ;;  %v75_v42 = vrot.slane %v74_v41, 2 }
  0xc5   :  { %v106_v38 = vadd.f32 %v105_v37, %v104_v36  ;;  %v76_v44 = vadd.f32 %v75_v42, %v74_v41 }
  0xc7   :  { %134 = vpush %v106_v38  ;;  %v77_v46 = vrot.slane %v76_v44, 1 }
  0xc9   :  { %v78_v48 = vadd.f32 %v77_v46, %v76_v44 }
  0xf8   :  { %s135_s2 = spop %134 }
  0xf9   :  { %v108_v47 = vstv %s135_s2 }
  0xfa   :  { %v133_v49 = vadd.f32 -32.0, %v108_v47 }
  0xfc   :  { %v113_v50 = vsel %vm112_vm2, %v78_v48, %v133_v49 }
  0xfd   :  { %115 = vst.msk [vmem:[#allocation7] sm:$0x1] %vm114_vm3, %v113_v50 }
  0xfe   :  { %200 = shalt.err (!%p197_p0)
}
  0xff   :  { %125 = dma.vmem_to_hbm [thread:$0]  %s123_s5, 16, %s289_s7, [#allocation4]  }
 0x100   :  { %213 = dma.done.wait [#allocation4], 16  }
 0x101   :  { %214 = vsyncadd [#allocation4], 4294967280 }
 0x102   :  { %129 = vsyncpa [#allocation3], 1 }
 0x103   :  { %130 = vsyncpa [#allocation6], 1 }
 0x104   :  { %131 = vsyncpa [#allocation4], 1 }

</bundles_post_ra>
